<compile_context>
chip_gen: v5e
topology: v5e:2x2
jax: 0.10.0
libtpu: 0.0.40
codegen_flags: <defaults>
</compile_context>

<pallas_src>
import math

import jax
import jax.numpy as jnp
from jax.experimental import pallas as pl
from jax.experimental.pallas import tpu as pltpu

C_PAD = 128  # lane-slot width per branch (keeps every branch lane-dense)


def _fused_conv_kernel(x_ref, w_ref, b_ref, lout_ref, o_ref):
    # x_ref:    (Bt, L + k_max - 1, D) bf16  -- zero-padded batch tile of activations
    # w_ref:    (k_max, D, C_total)   bf16  -- all branches packed along lanes
    # b_ref:    (1, C_total)          f32   -- packed bias
    # lout_ref: (1, C_total)          int32 -- per-lane valid conv window length
    # o_ref:    (Bt, C_total)         f32   -- lane-dense fused output tile
    Bt, Lp, D = x_ref.shape
    k_max, _, C = w_ref.shape
    L = Lp - (k_max - 1)

    # Per-tap MXU accumulation over the fused-branch lane width (no im2col slab).
    acc = None
    for j in range(k_max):
        x_tap = x_ref[:, pl.ds(j, L), :].reshape(Bt * L, D)            # bf16 (Bt*L, D)
        contrib = jnp.dot(x_tap, w_ref[j], preferred_element_type=jnp.float32)
        acc = contrib if acc is None else acc + contrib                # f32 (Bt*L, C)

    # Bias + ReLU in f32.
    acc = jnp.maximum(acc + b_ref[...], 0.0)

    # Mask positions past each branch's valid conv window. ReLU output >= 0, so
    # 0 is neutral for the max (do NOT reorder mask before the ReLU).
    acc = acc.reshape(Bt, L, C)
    pos = jax.lax.broadcasted_iota(jnp.int32, (Bt, L, C), 1)
    acc = jnp.where(pos < lout_ref[...].reshape(1, 1, C), acc, 0.0)

    # AdaptiveMaxPool1d(1): global max over the length dim; one dense store.
    o_ref[...] = jnp.max(acc, axis=1).astype(o_ref.dtype)


def init_params(key, num_channels, kernel_sizes, glove_dim):
    """Deterministic init matching nn.init.kaiming_uniform_ bounds; bias == 0."""
    params = []
    for c, k in zip(num_channels, kernel_sizes):
        key, sub = jax.random.split(key)
        fan_in = glove_dim * k
        bound = math.sqrt(6.0 / fan_in)  # kaiming_uniform_, a=0, leaky_relu gain
        w_torch = jax.random.uniform(sub, (c, glove_dim, k), jnp.float32,
                                     minval=-bound, maxval=bound)   # (C, D, k)
        w_kdc = jnp.transpose(w_torch, (2, 1, 0))                   # (k, D, C)
        b = jnp.zeros((c,), jnp.float32)                            # uniform_(0, 0)
        params.append((w_kdc, b))
    return params


def pack_params(params, seq_len, compute_dtype=jnp.bfloat16):
    """Pack all branches into one (k_max, D, nb*C_PAD) weight tensor (+bias, +l_out)."""
    kernel_sizes = [int(w.shape[0]) for w, _ in params]
    channels = tuple(int(w.shape[2]) for w, _ in params)
    D = int(params[0][0].shape[1])
    k_max = max(kernel_sizes)
    nb = len(params)
    c_total = nb * C_PAD

    w_full = jnp.zeros((k_max, D, c_total), jnp.float32)
    b_full = jnp.zeros((1, c_total), jnp.float32)
    lout_full = jnp.zeros((1, c_total), jnp.int32)
    for i, ((w_kdc, b), k) in enumerate(zip(params, kernel_sizes)):
        c = int(w_kdc.shape[2])
        l_out = seq_len - k + 1
        assert l_out >= 1, "kernel size larger than sequence length"
        assert c <= C_PAD, "branch channels exceed padded slot width"
        lo = i * C_PAD
        w_full = w_full.at[:k, :, lo:lo + c].set(w_kdc)       # taps j>=k stay zero
        b_full = b_full.at[:, lo:lo + c].set(b.reshape(1, -1))
        lout_full = lout_full.at[:, lo:lo + c].set(l_out)
    w_full = w_full.astype(compute_dtype)
    return w_full, b_full, lout_full, channels, k_max


def cnn_layers_forward(x_ncl, packed, b_tile=None):
    """x_ncl: (B, glove_dim, L), same layout as the PyTorch module's input."""
    w_full, b_full, lout_full, channels, k_max = packed
    B, D, L = x_ncl.shape
    c_total = int(w_full.shape[2])
    Lp = L + k_max - 1

    # NCL -> (B, L, D), cast bf16 (halves activation DMA), zero-pad L so per-tap
    # windows never read across batch elements. XLA fuses transpose+cast+pad.
    x_bld = jnp.transpose(x_ncl, (0, 2, 1)).astype(w_full.dtype)
    x_pad = jnp.pad(x_bld, ((0, 0), (0, k_max - 1), (0, 0)))

    if b_tile is None:
        # Whole batch for small B; modest tile otherwise (keeps the bf16 x tile
        # + f32 accumulator well under v7x's 64 MiB VMEM at production sizes).
        b_tile = B if B <= 64 else 32
    assert B % b_tile == 0, "batch must be divisible by the batch tile"

    out_pad = pl.pallas_call(
        _fused_conv_kernel,
        out_shape=jax.ShapeDtypeStruct((B, c_total), jnp.float32),
        grid_spec=pltpu.PrefetchScalarGridSpec(
            num_scalar_prefetch=0,
            grid=(B // b_tile,),
            in_specs=[
                pl.BlockSpec((b_tile, Lp, D), lambda i: (i, 0, 0)),        # x batch tile
                pl.BlockSpec((k_max, D, c_total), lambda i: (0, 0, 0)),    # resident weights
                pl.BlockSpec((1, c_total), lambda i: (0, 0)),              # resident bias
                pl.BlockSpec((1, c_total), lambda i: (0, 0)),              # resident l_out
            ],
            out_specs=pl.BlockSpec((b_tile, c_total), lambda i: (i, 0)),
        ),
        compiler_params=pltpu.CompilerParams(
            dimension_semantics=("parallel",)),   # B tiles split across v7x's 2 TCs
    )(x_pad, w_full, b_full, lout_full)

    outs = [out_pad[:, i * C_PAD:i * C_PAD + c] for i, c in enumerate(channels)]
    return jnp.concatenate(outs, axis=1)            # (B, sum(num_channels))


def cnn_layers_reference(x_ncl, params, compute_dtype=jnp.float32):
    """Pure-JAX reference (operands cast to compute_dtype, f32 accumulation)."""
    x_bld = jnp.transpose(x_ncl, (0, 2, 1)).astype(jnp.float32)
    outs = []
    for w_kdc, b in params:
        k, D, C = w_kdc.shape
        L = x_bld.shape[1]
        l_out = L - k + 1
        acc = jnp.zeros((x_bld.shape[0], l_out, C), jnp.float32)
        for j in range(k):
            acc = acc + jnp.einsum(
                'bld,dc->blc',
                x_bld[:, j:j + l_out, :].astype(compute_dtype),
                w_kdc[j].astype(compute_dtype),
                preferred_element_type=jnp.float32)
        acc = jnp.maximum(acc + b.reshape(1, 1, C), 0.0)
        outs.append(jnp.max(acc, axis=1))
    return jnp.concatenate(outs, axis=1)


if __name__ == "__main__":
    B, glove_dim, L = 2, 32, 16
    num_channels = (8, 16)
    kernel_sizes = (3, 5)

    key = jax.random.PRNGKey(0)
    kx, kp = jax.random.split(key)
    x = jax.random.normal(kx, (B, glove_dim, L), jnp.float32)   # NCL, like PyTorch
    params = init_params(kp, num_channels, kernel_sizes, glove_dim)
    packed = pack_params(params, L, compute_dtype=jnp.bfloat16)

    out = jax.block_until_ready(cnn_layers_forward(x, packed))

    ref_bf16 = cnn_layers_reference(x, params, compute_dtype=jnp.bfloat16)
    ref_f32 = cnn_layers_reference(x, params, compute_dtype=jnp.float32)

    assert out.shape == (B, sum(num_channels)), out.shape
    assert jnp.allclose(out, ref_bf16, atol=1e-3, rtol=1e-3), "mismatch vs bf16 reference"
    assert jnp.allclose(out, ref_f32, atol=3e-1, rtol=3e-1), "mismatch vs f32 reference"
    print("KERNEL_OK")
</pallas_src>

<mosaic_0001>
module attributes {stable_mosaic.version = 11 : i64} {
  func.func @_fused_conv_kernel(%arg0: i32, %arg1: memref<2x20x32xbf16, #tpu.memory_space<vmem>>, %arg2: memref<5x32x256xbf16, #tpu.memory_space<vmem>>, %arg3: memref<1x256xf32, #tpu.memory_space<vmem>>, %arg4: memref<1x256xi32, #tpu.memory_space<vmem>>, %arg5: memref<2x256xf32, #tpu.memory_space<vmem>>) attributes {dimension_semantics = [#tpu.dimension_semantics<parallel>], iteration_bounds = array<i64: 1>, scalar_prefetch = 0 : i64, scratch_operands = 0 : i64, tpu.core_type = #tpu.core_type<tc>, window_params = [{transform_indices = @transform_0, window_bounds = array<i64: 2, 20, 32>}, {pipeline_mode = #tpu.pipeline_mode<synchronous>, transform_indices = @transform_1, window_bounds = array<i64: 5, 32, 256>}, {pipeline_mode = #tpu.pipeline_mode<synchronous>, transform_indices = @transform_2, window_bounds = array<i64: 1, 256>}, {pipeline_mode = #tpu.pipeline_mode<synchronous>, transform_indices = @transform_3, window_bounds = array<i64: 1, 256>}, {transform_indices = @transform_4, window_bounds = array<i64: 2, 256>}]} {
    %c0 = arith.constant 0 : index
    %c0_0 = arith.constant 0 : index
    %c0_1 = arith.constant 0 : index
    %0 = vector.load %arg1[%c0, %c0_0, %c0_1] : memref<2x20x32xbf16, #tpu.memory_space<vmem>>, vector<2x16x32xbf16>
    %1 = vector.shape_cast %0 : vector<2x16x32xbf16> to vector<32x32xbf16>
    %c0_2 = arith.constant 0 : index
    %c0_3 = arith.constant 0 : index
    %c0_4 = arith.constant 0 : index
    %2 = vector.load %arg2[%c0_2, %c0_3, %c0_4] : memref<5x32x256xbf16, #tpu.memory_space<vmem>>, vector<1x32x256xbf16>
    %3 = vector.shape_cast %2 : vector<1x32x256xbf16> to vector<32x256xbf16>
    %cst = arith.constant dense<0.000000e+00> : vector<32x256xf32>
    %4 = tpu.matmul %1, %3, %cst {dimension_numbers = #tpu.dot_dimension_numbers<[1], [0], [0], [1], [0, 0, 1, 1], [], []>} : vector<32x32xbf16>, vector<32x256xbf16>, vector<32x256xf32> -> vector<32x256xf32>
    %c0_5 = arith.constant 0 : index
    %c1 = arith.constant 1 : index
    %c0_6 = arith.constant 0 : index
    %5 = vector.load %arg1[%c0_5, %c1, %c0_6] : memref<2x20x32xbf16, #tpu.memory_space<vmem>>, vector<2x16x32xbf16>
    %6 = vector.shape_cast %5 : vector<2x16x32xbf16> to vector<32x32xbf16>
    %c1_7 = arith.constant 1 : index
    %c0_8 = arith.constant 0 : index
    %c0_9 = arith.constant 0 : index
    %7 = vector.load %arg2[%c1_7, %c0_8, %c0_9] : memref<5x32x256xbf16, #tpu.memory_space<vmem>>, vector<1x32x256xbf16>
    %8 = vector.shape_cast %7 : vector<1x32x256xbf16> to vector<32x256xbf16>
    %cst_10 = arith.constant dense<0.000000e+00> : vector<32x256xf32>
    %9 = tpu.matmul %6, %8, %cst_10 {dimension_numbers = #tpu.dot_dimension_numbers<[1], [0], [0], [1], [0, 0, 1, 1], [], []>} : vector<32x32xbf16>, vector<32x256xbf16>, vector<32x256xf32> -> vector<32x256xf32>
    %10 = arith.addf %4, %9 : vector<32x256xf32>
    %c0_11 = arith.constant 0 : index
    %c2 = arith.constant 2 : index
    %c0_12 = arith.constant 0 : index
    %11 = vector.load %arg1[%c0_11, %c2, %c0_12] : memref<2x20x32xbf16, #tpu.memory_space<vmem>>, vector<2x16x32xbf16>
    %12 = vector.shape_cast %11 : vector<2x16x32xbf16> to vector<32x32xbf16>
    %c2_13 = arith.constant 2 : index
    %c0_14 = arith.constant 0 : index
    %c0_15 = arith.constant 0 : index
    %13 = vector.load %arg2[%c2_13, %c0_14, %c0_15] : memref<5x32x256xbf16, #tpu.memory_space<vmem>>, vector<1x32x256xbf16>
    %14 = vector.shape_cast %13 : vector<1x32x256xbf16> to vector<32x256xbf16>
    %cst_16 = arith.constant dense<0.000000e+00> : vector<32x256xf32>
    %15 = tpu.matmul %12, %14, %cst_16 {dimension_numbers = #tpu.dot_dimension_numbers<[1], [0], [0], [1], [0, 0, 1, 1], [], []>} : vector<32x32xbf16>, vector<32x256xbf16>, vector<32x256xf32> -> vector<32x256xf32>
    %16 = arith.addf %10, %15 : vector<32x256xf32>
    %c0_17 = arith.constant 0 : index
    %c3 = arith.constant 3 : index
    %c0_18 = arith.constant 0 : index
    %17 = vector.load %arg1[%c0_17, %c3, %c0_18] : memref<2x20x32xbf16, #tpu.memory_space<vmem>>, vector<2x16x32xbf16>
    %18 = vector.shape_cast %17 : vector<2x16x32xbf16> to vector<32x32xbf16>
    %c3_19 = arith.constant 3 : index
    %c0_20 = arith.constant 0 : index
    %c0_21 = arith.constant 0 : index
    %19 = vector.load %arg2[%c3_19, %c0_20, %c0_21] : memref<5x32x256xbf16, #tpu.memory_space<vmem>>, vector<1x32x256xbf16>
    %20 = vector.shape_cast %19 : vector<1x32x256xbf16> to vector<32x256xbf16>
    %cst_22 = arith.constant dense<0.000000e+00> : vector<32x256xf32>
    %21 = tpu.matmul %18, %20, %cst_22 {dimension_numbers = #tpu.dot_dimension_numbers<[1], [0], [0], [1], [0, 0, 1, 1], [], []>} : vector<32x32xbf16>, vector<32x256xbf16>, vector<32x256xf32> -> vector<32x256xf32>
    %22 = arith.addf %16, %21 : vector<32x256xf32>
    %c0_23 = arith.constant 0 : index
    %c4 = arith.constant 4 : index
    %c0_24 = arith.constant 0 : index
    %23 = vector.load %arg1[%c0_23, %c4, %c0_24] : memref<2x20x32xbf16, #tpu.memory_space<vmem>>, vector<2x16x32xbf16>
    %24 = vector.shape_cast %23 : vector<2x16x32xbf16> to vector<32x32xbf16>
    %c4_25 = arith.constant 4 : index
    %c0_26 = arith.constant 0 : index
    %c0_27 = arith.constant 0 : index
    %25 = vector.load %arg2[%c4_25, %c0_26, %c0_27] : memref<5x32x256xbf16, #tpu.memory_space<vmem>>, vector<1x32x256xbf16>
    %26 = vector.shape_cast %25 : vector<1x32x256xbf16> to vector<32x256xbf16>
    %cst_28 = arith.constant dense<0.000000e+00> : vector<32x256xf32>
    %27 = tpu.matmul %24, %26, %cst_28 {dimension_numbers = #tpu.dot_dimension_numbers<[1], [0], [0], [1], [0, 0, 1, 1], [], []>} : vector<32x32xbf16>, vector<32x256xbf16>, vector<32x256xf32> -> vector<32x256xf32>
    %28 = arith.addf %22, %27 : vector<32x256xf32>
    %c0_29 = arith.constant 0 : index
    %c0_30 = arith.constant 0 : index
    %29 = vector.load %arg3[%c0_29, %c0_30] : memref<1x256xf32, #tpu.memory_space<vmem>>, vector<1x256xf32>
    %30 = vector.broadcast %29 : vector<1x256xf32> to vector<32x256xf32>
    %31 = arith.addf %28, %30 : vector<32x256xf32>
    %cst_31 = arith.constant 0.000000e+00 : f32
    %32 = vector.broadcast %cst_31 : f32 to vector<32x256xf32>
    %33 = arith.maximumf %31, %32 : vector<32x256xf32>
    %34 = vector.shape_cast %33 : vector<32x256xf32> to vector<2x16x256xf32>
    %35 = tpu.iota {dimensions = array<i32: 1>} : vector<2x16x256xi32>
    %c0_32 = arith.constant 0 : index
    %c0_33 = arith.constant 0 : index
    %36 = vector.load %arg4[%c0_32, %c0_33] : memref<1x256xi32, #tpu.memory_space<vmem>>, vector<1x256xi32>
    %37 = vector.shape_cast %36 : vector<1x256xi32> to vector<1x1x256xi32>
    %38 = vector.broadcast %37 : vector<1x1x256xi32> to vector<2x16x256xi32>
    %39 = arith.cmpi slt, %35, %38 : vector<2x16x256xi32>
    %cst_34 = arith.constant 0.000000e+00 : f32
    %40 = vector.broadcast %cst_34 : f32 to vector<2x16x256xf32>
    %41 = arith.select %39, %34, %40 : vector<2x16x256xi1>, vector<2x16x256xf32>
    %cst_35 = arith.constant dense<0xFF800000> : vector<2x256xf32>
    %42 = vector.multi_reduction <maximumf>, %41, %cst_35 [1] : vector<2x16x256xf32> to vector<2x256xf32>
    %c0_36 = arith.constant 0 : index
    %c0_37 = arith.constant 0 : index
    %43 = vector.load %arg5[%c0_36, %c0_37] : memref<2x256xf32, #tpu.memory_space<vmem>>, vector<2x256xf32>
    tpu.vector_store %arg5[%c0_36, %c0_37], %42 {strides = array<i32>} : memref<2x256xf32, #tpu.memory_space<vmem>>, vector<2x256xf32>,
    return
  }
  func.func @transform_0(%arg0: i32) -> (i32, i32, i32) {
    %c0_i32 = arith.constant 0 : i32
    %c0_i32_0 = arith.constant 0 : i32
    %c0_i32_1 = arith.constant 0 : i32
    return %arg0, %c0_i32, %c0_i32_0 : i32, i32, i32
  }
  func.func @transform_1(%arg0: i32) -> (i32, i32, i32) {
    %c0_i32 = arith.constant 0 : i32
    %c0_i32_0 = arith.constant 0 : i32
    %c0_i32_1 = arith.constant 0 : i32
    %c0_i32_2 = arith.constant 0 : i32
    return %c0_i32, %c0_i32_0, %c0_i32_1 : i32, i32, i32
  }
  func.func @transform_2(%arg0: i32) -> (i32, i32) {
    %c0_i32 = arith.constant 0 : i32
    %c0_i32_0 = arith.constant 0 : i32
    %c0_i32_1 = arith.constant 0 : i32
    return %c0_i32, %c0_i32_0 : i32, i32
  }
  func.func @transform_3(%arg0: i32) -> (i32, i32) {
    %c0_i32 = arith.constant 0 : i32
    %c0_i32_0 = arith.constant 0 : i32
    %c0_i32_1 = arith.constant 0 : i32
    return %c0_i32, %c0_i32_0 : i32, i32
  }
  func.func @transform_4(%arg0: i32) -> (i32, i32) {
    %c0_i32 = arith.constant 0 : i32
    %c0_i32_0 = arith.constant 0 : i32
    return %arg0, %c0_i32 : i32, i32
  }
}

</mosaic_0001>

<bundles_post_ra>
// kernel: tpu_custom_call.1
= control target key start
LH: loop header
LB: loop body
LE: loop exit
PB: predicated region body
PF: predicated region fallthrough
CT: control target
= control target key end

     0   :  { %9 = vsyncpa [#allocation3], 0  ;;  %s1160_s0 = inlined_call_operand.vmem [shape: bf16[2,20,32], index: 0, kind: input, shape index: {}]   ;;  %s1161_s1 = inlined_call_operand.hbm [shape: bf16[5,32,256], index: 1, kind: input, shape index: {}]   ;;  %s1162_s2 = inlined_call_operand.vmem [shape: f32[1,256], index: 2, kind: input, shape index: {}]   ;;  %s1163_s3 = inlined_call_operand.vmem [shape: s32[1,256], index: 3, kind: input, shape index: {}]   ;;  %s1164_s4 = inlined_call_operand.hbm [shape: f32[2,256], index: 4, kind: output, shape index: {}]  }
   0x1   :  { %10 = vsyncpa [#allocation4], 0  ;;  %s17_s17 = sshll.u32 %s1161_s1, 4  ;;  %s895_s18 = smov [#allocation2]   ;;  %s18_s17 = int_to_ptr.hbm [resolvable:$true] %s17_s17 }
   0x2   :  { %s19_s19 = sshll.u32 %s895_s18, 4  ;;  %s896_s20 = smov 128   ;;  %s20_s19 = int_to_ptr.vmem [resolvable:$true] %s19_s19 }
   0x3   :  { %s897_s21 = smov 8  }
   0x4   :  { %25 = dma.hbm_to_vmem [thread:$0]  %s18_s17, 2560, %s20_s19, [#allocation3], %s896_s20, %s896_s20, %s897_s21  }
   0x5   :  { %891 = dma.done.wait [#allocation3], 2560  }
   0x6   :  { %892 = vsyncadd [#allocation3], 4294964736  ;;  %vm45_vm0 = vsmask.f32 3328  ;;  %vm46_vm1 = vsmask.f32 7440 }
   0x7   :  { %v711_v0 = vld [vmem:[#allocation2 + $0x30] sm:$0xf]  ;;  %v822_v1 = vld [vmem:[#allocation2 + $0x34] sm:$0xf0]  ;;  %v821_v2 = vld [vmem:[#allocation2 + $0x34] sm:$0xf] }
   0x8   :  { %v712_v3 = vor.u32 %v822_v1, %v711_v0  ;;  %v713_v4 = vld [vmem:[#allocation2 + $0x38] sm:$0xf0]  ;;  %v703_v5 = vld [vmem:[#allocation2 + $0x20] sm:$0xf]  ;;  %v820_v6 = vld [vmem:[#allocation2 + $0x24] sm:$0xf0] }
   0x9   :  { %v716_v7 = vor.u32 %v821_v2, %v713_v4  ;;  %v819_v8 = vld [vmem:[#allocation2 + $0x24] sm:$0xf]  ;;  %v705_v9 = vld [vmem:[#allocation2 + $0x28] sm:$0xf0]  ;;  %v704_v11 = vor.u32 %v820_v6, %v703_v5  ;;  %v933_v12 = vld [vmem:[%s1160_s0 + $0x10] sm:$0xf] }
   0xa   :  { %v37_v10 = vld [vmem:[%s1160_s0 + $0xc] sm:$0xf]  ;;  %835 = vmatpush.bf16.msra.mxu2 %v712_v3  ;;  %140 = vmatpush.bf16.msra.mxu0 %v712_v3  ;;  %v938_v13 = vld [vmem:[%s1160_s0 + $0x14] sm:$0x1]  ;;  %v708_v16 = vor.u32 %v819_v8, %v705_v9  ;;  %v82_v17 = vshll.u32 %v933_v12, 16  ;;  %v86_v18 = vshrl.u32 %v933_v12, 16  ;;  %vm964_vm2 = vmor %vm45_vm0, %vm46_vm1 }
   0xb   :  { %v73_v14 = vshrl.u32 %v37_v10, 16  ;;  %v76_v15 = vshll.u32 %v37_v10, 16  ;;  %159 = vmatpush.bf16.msra.mxu1 %v716_v7  ;;  %837 = vmatpush.bf16.msra.mxu3 %v716_v7  ;;  %v92_v19 = vshll.u32 %v938_v13, 16  ;;  %v35_v20 = vld [vmem:[%s1160_s0] sm:$0xf]  ;;  %vm127_vm3 = vcmask 261120  }
   0xc   :  { %v949_v23 = vld [vmem:[%s1160_s0 + $0x4] sm:$0xf]  ;;  %v954_v24 = vld [vmem:[%s1160_s0 + $0x8] sm:$0x1]  ;;  %v84_v25 = vrot.slane %v82_v17, 5  ;;  %v88_v26 = vrot.slane %v86_v18, 4 }
   0xd   :  { %v75_v21 = vrot.slane %v73_v14, 4  ;;  %v78_v22 = vrot.slane %v76_v15, 5  ;;  %v94_v27 = vrot.slane %v92_v19, 5  ;;  %v49_v28 = vshrl.u32 %v35_v20, 16  ;;  %v817_v33 = vld [vmem:[#allocation2 + $0x14] sm:$0xf] }
   0xe   :  { %836 = vmatpush.bf16.msra.mxu2 %v704_v11  ;;  %141 = vmatpush.bf16.msra.mxu0 %v704_v11  ;;  %v52_v30 = vshll.u32 %v35_v20, 16  ;;  %v58_v31 = vshll.u32 %v949_v23, 16  ;;  %v62_v32 = vshrl.u32 %v949_v23, 16  ;;  %v89_v35 = vor.u32 %v88_v26, %v84_v25  ;;  %v741_v38 = vld [vmem:[#allocation2 + $0x18] sm:$0xf0]  ;;  %s691_s27 = sshll.u32 %s1164_s4, 4  ;;  %s692_s27 = int_to_ptr.hbm [resolvable:$true] %s691_s27 }
   0xf   :  { %v79_v29 = vor.u32 %v78_v22, %v75_v21  ;;  %160 = vmatpush.bf16.msra.mxu1 %v708_v16  ;;  %838 = vmatpush.bf16.msra.mxu3 %v708_v16  ;;  %v51_v36 = vrot.slane %v49_v28, 4  ;;  %v68_v37 = vshll.u32 %v954_v24, 16  ;;  %v739_v39 = vld [vmem:[#allocation2 + $0x10] sm:$0xf]  ;;  %v818_v44 = vld [vmem:[#allocation2 + $0x14] sm:$0xf0]  ;;  %v744_v51 = vor.u32 %v817_v33, %v741_v38 }
  0x10   :  { %v54_v41 = vrot.slane %v52_v30, 5  ;;  %v60_v42 = vrot.slane %v58_v31, 5  ;;  %v64_v43 = vrot.slane %v62_v32, 4  ;;  %v90_v45 = vrot.slane %v89_v35, 4  ;;  %v815_v47 = vld [vmem:[#allocation2 + $0x4] sm:$0xf] }
  0x11   :  { %v80_v40 = vrot.slane %v79_v29, 4  ;;  %v70_v46 = vrot.slane %v68_v37, 5  ;;  %v733_v52 = vld [vmem:[#allocation2 + $0x8] sm:$0xf0]  ;;  %v825_v53 = vld [vmem:[#allocation2 + $0x54] sm:$0xf]  ;;  %v740_v57 = vor.u32 %v818_v44, %v739_v39 }
  0x12   :  { %v55_v49 = vor.u32 %v54_v41, %v51_v36  ;;  %v65_v50 = vor.u32 %v64_v43, %v60_v42  ;;  %v763_v54 = vld [vmem:[#allocation2 + $0x58] sm:$0xf0]  ;;  %v95_v55 = vsel %vm964_vm2, %v90_v45, %v94_v27  ;;  %v731_v58 = vld [vmem:[#allocation2] sm:$0xf]  ;;  %v816_v59 = vld [vmem:[#allocation2 + $0x4] sm:$0xf0]  ;;  %v736_v2 = vor.u32 %v815_v47, %v733_v52 }
  0x13   :  { %v85_v48 = vsel %vm964_vm2, %v80_v40, %v84_v25  ;;  %v761_v60 = vld [vmem:[#allocation2 + $0x50] sm:$0xf]  ;;  %v104_v61 = vunpack.c.l.b16 %v95_v55  ;;  %233 = vmatpush.bf16.msrb.mxu3 %v744_v51  ;;  %v826_v0 = vld [vmem:[#allocation2 + $0x54] sm:$0xf0]  ;;  %v823_v1 = vld [vmem:[#allocation2 + $0x44] sm:$0xf]  ;;  %214 = vmatpush.bf16.msrb.mxu2 %v740_v57  ;;  %v766_v3 = vor.u32 %v825_v53, %v763_v54  ;;  %v732_v4 = vor.u32 %v816_v59, %v731_v58 }
  0x14   :  { %v103_v56 = vunpack.c.l.b16 %v85_v48  ;;  %v56_v62 = vrot.slane %v55_v49, 4  ;;  %v66_v63 = vrot.slane %v65_v50, 4  ;;  %v762_v5 = vor.u32 %v826_v0, %v761_v60  ;;  %v755_v6 = vld [vmem:[#allocation2 + $0x48] sm:$0xf0]  ;;  %v753_v7 = vld [vmem:[#allocation2 + $0x40] sm:$0xf] }
  0x15   :  { %v824_v8 = vld [vmem:[#allocation2 + $0x44] sm:$0xf0]  ;;  %v829_v14 = vld [vmem:[#allocation2 + $0x74] sm:$0xf]  ;;  %v783_v15 = vld [vmem:[#allocation2 + $0x78] sm:$0xf0]  ;;  %331 = vmatpush.bf16.msrb.mxu1 %v766_v3  ;;  %v758_v22 = vor.u32 %v823_v1, %v755_v6 }
  0x16   :  { %v106_v9 = vpack.c.b16 %v104_v61, %v103_v56  ;;  %v61_v10 = vsel %vm964_vm2, %v56_v62, %v60_v42  ;;  %v71_v11 = vsel %vm964_vm2, %v66_v63, %v70_v46  ;;  %312 = vmatpush.bf16.msrb.mxu0 %v762_v5  ;;  %vm252_vm4 = vcmask 1042432   ;;  %v781_v20 = vld [vmem:[#allocation2 + $0x70] sm:$0xf]  ;;  %v830_v21 = vld [vmem:[#allocation2 + $0x74] sm:$0xf0]  ;;  %v813_v58 = vld [vmem:[%s1160_s0] sm:$0xff] }
  0x17   :  { %v101_v16 = vunpack.c.l.b16 %v61_v10  ;;  %v102_v19 = vunpack.c.l.b16 %v71_v11  ;;  %vm253_vm5 = vcmask 1046532   ;;  %v754_v25 = vor.u32 %v824_v8, %v753_v7  ;;  %v986_v26 = vld [vmem:[%s1160_s0] sm:$0xe]  ;;  %v833_v29 = vld [vmem:[#allocation2 + $0x94] sm:$0xf]  ;;  %234 = vmatpush.bf16.msrb.mxu3 %v736_v2  ;;  %215 = vmatpush.bf16.msrb.mxu2 %v732_v4 }
  0x18   :  { %718 = vmatmul.msk.bf16.vlgmr.msra.gmra.mxu2 %vm127_vm3, %v106_v9  ;;  %720 = vmatmul.msk.bf16.vlgmr.msra.gmra.mxu3 %vm127_vm3, %v106_v9  ;;  %v257_v27 = vrot.slane %v949_v23, 5  ;;  %v786_v28 = vor.u32 %v829_v14, %v783_v15  ;;  %v782_v33 = vor.u32 %v830_v21, %v781_v20  ;;  %v805_v34 = vld [vmem:[#allocation2 + $0x98] sm:$0xf0]  ;;  %v803_v35 = vld [vmem:[#allocation2 + $0x90] sm:$0xf]  ;;  %v260_v37 = vrot.slane %v954_v24, 5  ;;  %vm994_vm6 = vmor %vm252_vm4, %vm253_vm5 }
  0x19   :  { %v105_v30 = vpack.c.b16 %v102_v19, %v101_v16  ;;  %v834_v36 = vld [vmem:[#allocation2 + $0x94] sm:$0xf0]  ;;  %v808_v38 = vor.u32 %v833_v29, %v805_v34  ;;  %v827_v40 = vld [vmem:[#allocation2 + $0x64] sm:$0xf]  ;;  %v775_v41 = vld [vmem:[#allocation2 + $0x68] sm:$0xf0]  ;;  %332 = vmatpush.bf16.msrb.mxu1 %v758_v22 }
  0x1a   :  { %v804_v39 = vor.u32 %v834_v36, %v803_v35  ;;  %313 = vmatpush.bf16.msrb.mxu0 %v754_v25  ;;  %v749_v43 = vrot.slane %v986_v26, 9  ;;  %v259_v44 = vrot.slane %v257_v27, 4  ;;  %v778_v45 = vor.u32 %v827_v40, %v775_v41  ;;  %v773_v46 = vld [vmem:[#allocation2 + $0x60] sm:$0xf]  ;;  %v828_v24 = vld [vmem:[#allocation2 + $0x64] sm:$0xf0] }
  0x1b   :  { %465 = vmatpush.bf16.msra.mxu3 %v786_v28  ;;  %719 = vmatmul.msk.bf16.vlgmr.msra.gmra.mxu1 %vm127_vm3, %v105_v30  ;;  %v774_v47 = vor.u32 %v828_v24, %v773_v46  ;;  %v831_v48 = vld [vmem:[#allocation2 + $0x84] sm:$0xf]  ;;  %v797_v49 = vld [vmem:[#allocation2 + $0x88] sm:$0xf0]  ;;  %v795_v50 = vld [vmem:[#allocation2 + $0x80] sm:$0xf] }
  0x1c   :  { %717 = vmatmul.msk.bf16.vlgmr.msra.gmra.mxu0 %vm127_vm3, %v105_v30  ;;  %446 = vmatpush.bf16.msra.mxu2 %v782_v33  ;;  %v800_v51 = vor.u32 %v831_v48, %v797_v49  ;;  %v832_v52 = vld [vmem:[#allocation2 + $0x84] sm:$0xf0]  ;;  %v258_v54 = vsel %vm994_vm6, %v749_v43, %v257_v27  ;;  %v261_v55 = vsel %vm994_vm6, %v259_v44, %v260_v37  ;;  %v264_v60 = vrot.slane %v933_v12, 5  ;;  %v247_v61 = vld [vmem:[%s1160_s0 + $0xc] sm:$0xe] }
  0x1d   :  { %571 = vmatpush.bf16.msra.mxu1 %v808_v38  ;;  %v796_v53 = vor.u32 %v832_v52, %v795_v50  ;;  %v274_v56 = vunpack.c.l.b16 %v258_v54  ;;  %v275_v57 = vunpack.c.l.b16 %v261_v55  ;;  %v389_v62 = vrot.slane %v86_v18, 5  ;;  %v352_v6 = vld [vmem:[%s1160_s0 + $0x8] sm:$0x3]  ;;  %v814_v16 = vld [vmem:[%s1160_s0 + $0xc] sm:$0xff]  ;;  %v486_v28 = vld [vmem:[%s1160_s0] sm:$0xc] }
  0x1e   :  { %552 = vmatpush.bf16.msra.mxu0 %v804_v39  ;;  %v390_v63 = vrot.slane %v82_v17, 6  ;;  %v750_v0 = vrot.slane %v247_v61, 9  ;;  %v266_v1 = vrot.slane %v264_v60, 4  ;;  %v267_v2 = vrot.slane %v938_v13, 5  ;;  %v353_v39 = vld [vmem:[%s1160_s0 + $0x14] sm:$0x3] }
  0x1f   :  { %466 = vmatpush.bf16.msra.mxu3 %v778_v45  ;;  %v278_v59 = vpack.c.b16 %v275_v57, %v274_v56  ;;  %v358_v3 = vshrl.u32 %v986_v26, 16  ;;  %v361_v4 = vshll.u32 %v986_v26, 16  ;;  %v366_v18 = vrot.slane %v62_v32, 5 }
  0x20   :  { %447 = vmatpush.bf16.msra.mxu2 %v774_v47  ;;  %v1021_v5 = vor.u32 %v390_v63, %v389_v62  ;;  %v367_v17 = vrot.slane %v58_v31, 6  ;;  %v265_v7 = vsel %vm994_vm6, %v750_v0, %v264_v60  ;;  %v268_v13 = vsel %vm994_vm6, %v266_v1, %v267_v2 }
  0x21   :  { %572 = vmatpush.bf16.msra.mxu1 %v800_v51  ;;  %v360_v8 = vrot.slane %v358_v3, 5  ;;  %v363_v9 = vrot.slane %v361_v4, 6  ;;  %v372_v10 = vshrl.u32 %v352_v6, 16  ;;  %v375_v11 = vshll.u32 %v352_v6, 16 }
  0x22   :  { %553 = vmatpush.bf16.msra.mxu0 %v796_v53  ;;  %v276_v14 = vunpack.c.l.b16 %v265_v7  ;;  %v277_v15 = vunpack.c.l.b16 %v268_v13  ;;  %v368_v32 = vor.u32 %v367_v17, %v366_v18  ;;  %vm354_vm7 = vsmask.f32 2304 }
  0x23   :  { %v364_v19 = vor.u32 %v363_v9, %v360_v8  ;;  %v374_v20 = vrot.slane %v372_v10, 5  ;;  %v377_v31 = vrot.slane %v375_v11, 6  ;;  %vm355_vm8 = vsmask.f32 6416 }
  0x24   :  { %v279_v21 = vpack.c.b16 %v277_v15, %v276_v14  ;;  %v497_v22 = vrot.slane %v949_v23, 6  ;;  %v370_v26 = vrot.slane %v368_v32, 4  ;;  %vm1043_vm9 = vmor %vm354_vm7, %vm355_vm8  ;;  %vm492_vm10 = vcmask 1041408  }
  0x25   :  { %v365_v25 = vrot.slane %v364_v19, 4  ;;  %v378_v27 = vor.u32 %v377_v31, %v374_v20  ;;  %vm493_vm11 = vcmask 1045508   ;;  %v791_v30 = vrot.slane %v486_v28, 10 }
  0x26   :  { %v499_v33 = vrot.slane %v497_v22, 4  ;;  %v500_v23 = vrot.slane %v352_v6, 6  ;;  %vm1054_vm12 = vmor %vm492_vm10, %vm493_vm11  ;;  %v381_v37 = vshrl.u32 %v247_v61, 16  ;;  %v384_v38 = vshll.u32 %v247_v61, 16 }
  0x27   :  { %v369_v34 = vsel %vm1043_vm9, %v365_v25, %v368_v32  ;;  %v379_v35 = vsel %vm1043_vm9, %v370_v26, %v378_v27  ;;  %v498_v42 = vsel %vm1054_vm12, %v791_v30, %v497_v22  ;;  %v395_v46 = vshrl.u32 %v353_v39, 16 }
  0x28   :  { %745 = vmatmul.msk.bf16.vlgmr.msrb.gmra.mxu2 %vm127_vm3, %v813_v58  ;;  %747 = vmatmul.msk.bf16.vlgmr.msrb.gmra.mxu3 %vm127_vm3, %v813_v58  ;;  %v408_v40 = vunpack.c.l.b16 %v369_v34  ;;  %v409_v41 = vunpack.c.l.b16 %v379_v35  ;;  %v501_v43 = vsel %vm1054_vm12, %v499_v33, %v500_v23  ;;  %v383_v44 = vrot.slane %v381_v37, 5  ;;  %v487_v58 = vld [vmem:[%s1160_s0 + $0xc] sm:$0xc] }
  0x29   :  { %v386_v45 = vrot.slane %v384_v38, 6  ;;  %v398_v24 = vshll.u32 %v353_v39, 16  ;;  %v514_v47 = vunpack.c.l.b16 %v498_v42  ;;  %v515_v48 = vunpack.c.l.b16 %v501_v43 }
  0x2a   :  { %v412_v49 = vpack.c.b16 %v409_v41, %v408_v40  ;;  %v397_v51 = vrot.slane %v395_v46, 5  ;;  %v504_v54 = vrot.slane %v933_v12, 6  ;;  %v393_v56 = vrot.slane %v1021_v5, 4  ;;  %v592_v40 = vld [vmem:[%s1162_s2] sm:$0x3]  ;;  %s898_s2 = smov [#allocation5]  }
  0x2b   :  { %769 = vmatmul.msk.bf16.vlgmr.msrb.gmra.mxu1 %vm127_vm3, %v278_v59  ;;  %v387_v50 = vor.u32 %v386_v45, %v383_v44  ;;  %v400_v52 = vrot.slane %v398_v24, 6  ;;  %v518_v53 = vpack.c.b16 %v515_v48, %v514_v47  ;;  %v507_v61 = vrot.slane %v353_v39, 6 }
  0x2c   :  { %767 = vmatmul.msk.bf16.vlgmr.msrb.gmra.mxu0 %vm127_vm3, %v278_v59  ;;  %v792_v59 = vrot.slane %v487_v58, 10  ;;  %v506_v60 = vrot.slane %v504_v54, 4  ;;  %v1102_v46 = vperm.slane %v592_v40, 0  ;;  %v614_v47 = vlaneseq }
  0x2d   :  { %v388_v55 = vrot.slane %v387_v50, 4  ;;  %v401_v57 = vor.u32 %v400_v52, %v397_v51  ;;  %v617_v52 = vld [vmem:[%s1163_s3] sm:$0x3]  ;;  %vm674_vm1 = vcmask 1041409   ;;  %vm676_vm2 = vcmask 1043459   ;;  %s689_s3 = sshll.u32 %s898_s2, 4  ;;  %s690_s3 = int_to_ptr.vmem [resolvable:$true] %s689_s3 }
  0x2e   :  { %v505_v1 = vsel %vm1054_vm12, %v792_v59, %v504_v54  ;;  %v508_v2 = vsel %vm1054_vm12, %v506_v60, %v507_v61  ;;  %v618_v60 = vperm.slane %v617_v52, 0  ;;  %v619_v61 = vperm.slane %v617_v52, 1 }
  0x2f   :  { %v392_v62 = vsel %vm1043_vm9, %v388_v55, %v1021_v5  ;;  %v402_v12 = vsel %vm1043_vm9, %v393_v56, %v401_v57  ;;  %v516_v3 = vunpack.c.l.b16 %v505_v1  ;;  %v517_v4 = vunpack.c.l.b16 %v508_v2 }
  0x30   :  { %v410_v63 = vunpack.c.l.b16 %v392_v62  ;;  %v411_v0 = vunpack.c.l.b16 %v402_v12  ;;  %v615_v56 = vshrl.u32 %v614_v47, 7  ;;  %vm680_vm4 = vcmask 1047559  }
  0x31   :  { %v519_v18 = vpack.c.b16 %v517_v4, %v516_v3 }
  0x32   :  { %v413_v6 = vpack.c.b16 %v411_v0, %v410_v63  ;;  %v616_v63 = vadd.s32 8, %v615_v56  ;;  %vm1111_vm13 = vcmp.lt.s32.totalorder %v615_v56, %v618_v60  ;;  %vm1115_vm14 = vcmp.lt.s32.totalorder %v615_v56, %v619_v61 }
  0x34   :  { %vm1121_vm15 = vcmp.lt.s32.totalorder %v616_v63, %v618_v60  ;;  %vm1125_vm0 = vcmp.lt.s32.totalorder %v616_v63, %v619_v61 }
  0x38   :  { %746 = vmatmul.msk.bf16.gmra.mxu2 %vm127_vm3, %v814_v16  ;;  %748 = vmatmul.msk.bf16.gmra.mxu3 %vm127_vm3, %v814_v16 }
  0x3b   :  { %770 = vmatmul.msk.bf16.gmra.mxu1 %vm127_vm3, %v279_v21 }
  0x3c   :  { %768 = vmatmul.msk.bf16.gmra.mxu0 %vm127_vm3, %v279_v21 }
  0x48   :  { %787 = vmatmul.msk.bf16.vlgmr.msra.gmra.mxu2 %vm127_vm3, %v412_v49  ;;  %789 = vmatmul.msk.bf16.vlgmr.msra.gmra.mxu3 %vm127_vm3, %v412_v49  ;;  %v1104_v49 = vperm.slane %v592_v40, 1 }
  0x4b   :  { %811 = vmatmul.msk.bf16.vlgmr.msra.gmra.mxu1 %vm127_vm3, %v518_v53 }
  0x4c   :  { %809 = vmatmul.msk.bf16.vlgmr.msra.gmra.mxu0 %vm127_vm3, %v518_v53 }
  0x58   :  { %788 = vmatmul.msk.bf16.gmra.mxu2 %vm127_vm3, %v413_v6  ;;  %790 = vmatmul.msk.bf16.gmra.mxu3 %vm127_vm3, %v413_v6 }
  0x5b   :  { %812 = vmatmul.msk.bf16.gmra.mxu1 %vm127_vm3, %v519_v18 }
  0x5c   :  { %810 = vmatmul.msk.bf16.gmra.mxu0 %vm127_vm3, %v519_v18  ;;  %vm678_vm3 = vcmask 1045509  }
  0x98   :  { %v162_v5 = vpop.f32.mrf.mxu1 }
  0x99   :  { %v143_v17 = vpop.f32.mrf.mxu0 }
  0x9b   :  { %v148_v7 = vpop.f32.mrf.mxu2  ;;  %v167_v13 = vpop.f32.mrf.mxu3 }
  0xa0   :  { %v164_v8 = vpop.f32.mrf.mxu1 }
  0xa1   :  { %v145_v9 = vpop.f32.mrf.mxu0 }
  0xa3   :  { %v1087_v10 = vpop.f32.mrf.mxu2  ;;  %v1089_v11 = vpop.f32.mrf.mxu3 }
  0xa8   :  { %v334_v14 = vpop.f32.mrf.mxu1 }
  0xa9   :  { %v315_v15 = vpop.f32.mrf.mxu0 }
  0xab   :  { %v217_v16 = vpop.f32.mrf.mxu2  ;;  %v236_v32 = vpop.f32.mrf.mxu3 }
  0xac   :  { %v218_v23 = vadd.f32 %v217_v16, %v143_v17  ;;  %v237_v34 = vadd.f32 %v236_v32, %v162_v5 }
  0xae   :  { %v344_v37 = vadd.f32 %v315_v15, %v218_v23  ;;  %v345_v38 = vadd.f32 %v334_v14, %v237_v34 }
  0xb0   :  { %v336_v19 = vpop.f32.mrf.mxu1 }
  0xb1   :  { %v317_v20 = vpop.f32.mrf.mxu0 }
  0xb3   :  { %v219_v31 = vpop.f32.mrf.mxu2  ;;  %v238_v21 = vpop.f32.mrf.mxu3 }
  0xb4   :  { %v220_v44 = vadd.f32 %v219_v31, %v145_v9  ;;  %v239_v45 = vadd.f32 %v238_v21, %v164_v8 }
  0xb6   :  { %v346_v53 = vadd.f32 %v317_v20, %v220_v44  ;;  %v347_v54 = vadd.f32 %v336_v19, %v239_v45 }
  0xb8   :  { %v339_v22 = vpop.f32.mrf.mxu1 }
  0xb9   :  { %v320_v25 = vpop.f32.mrf.mxu0 }
  0xbb   :  { %v222_v26 = vpop.f32.mrf.mxu2  ;;  %v241_v27 = vpop.f32.mrf.mxu3 }
  0xbc   :  { %v223_v0 = vadd.f32 %v222_v26, %v148_v7  ;;  %v242_v1 = vadd.f32 %v241_v27, %v167_v13 }
  0xbe   :  { %v348_v32 = vadd.f32 %v320_v25, %v223_v0  ;;  %v349_v19 = vadd.f32 %v339_v22, %v242_v1 }
  0xc0   :  { %v1091_v28 = vpop.f32.mrf.mxu1 }
  0xc1   :  { %v1093_v29 = vpop.f32.mrf.mxu0 }
  0xc3   :  { %v1095_v30 = vpop.f32.mrf.mxu2  ;;  %v1097_v33 = vpop.f32.mrf.mxu3 }
  0xc4   :  { %v225_v22 = vadd.f32 %v1095_v30, %v1087_v10  ;;  %v244_v25 = vadd.f32 %v1097_v33, %v1089_v11 }
  0xc6   :  { %v350_v44 = vadd.f32 %v1093_v29, %v225_v22  ;;  %v351_v45 = vadd.f32 %v1091_v28, %v244_v25 }
  0xc8   :  { %v574_v35 = vpop.f32.mrf.mxu1 }
  0xc9   :  { %v555_v36 = vpop.f32.mrf.mxu0 }
  0xcb   :  { %v449_v39 = vpop.f32.mrf.mxu2  ;;  %v468_v41 = vpop.f32.mrf.mxu3 }
  0xcc   :  { %v478_v42 = vadd.f32 %v449_v39, %v344_v37  ;;  %v479_v43 = vadd.f32 %v468_v41, %v345_v38 }
  0xce   :  { %v584_v24 = vadd.f32 %v555_v36, %v478_v42  ;;  %v585_v48 = vadd.f32 %v574_v35, %v479_v43 }
  0xd0   :  { %v576_v50 = vpop.f32.mrf.mxu1  ;;  %v598_v55 = vadd.f32 %v1102_v46, %v584_v24  ;;  %v599_v57 = vadd.f32 %v1104_v49, %v585_v48 }
  0xd1   :  { %v557_v51 = vpop.f32.mrf.mxu0 }
  0xd2   :  { %v606_v4 = vmax.f32 %v598_v55, 0.0  ;;  %v607_v6 = vmax.f32 %v599_v57, 0.0 }
  0xd3   :  { %v451_v58 = vpop.f32.mrf.mxu2  ;;  %v470_v59 = vpop.f32.mrf.mxu3 }
  0xd4   :  { %v480_v62 = vadd.f32 %v451_v58, %v346_v53  ;;  %v481_v12 = vadd.f32 %v470_v59, %v347_v54  ;;  %v624_v20 = vsel %vm1111_vm13, %v606_v4, 0.0  ;;  %v625_v31 = vsel %vm1115_vm14, %v607_v6, 0.0 }
  0xd6   :  { %v586_v2 = vadd.f32 %v557_v51, %v480_v62  ;;  %v587_v3 = vadd.f32 %v576_v50, %v481_v12 }
  0xd8   :  { %v600_v17 = vadd.f32 %v1102_v46, %v586_v2  ;;  %v601_v8 = vadd.f32 %v1104_v49, %v587_v3  ;;  %v579_v15 = vpop.f32.mrf.mxu1 }
  0xd9   :  { %v560_v16 = vpop.f32.mrf.mxu0 }
  0xda   :  { %v608_v13 = vmax.f32 %v600_v17, 0.0  ;;  %v609_v14 = vmax.f32 %v601_v8, 0.0 }
  0xdb   :  { %v454_v21 = vpop.f32.mrf.mxu2  ;;  %v473_v26 = vpop.f32.mrf.mxu3 }
  0xdc   :  { %v626_v27 = vsel %vm1121_vm15, %v608_v13, 0.0  ;;  %v627_v23 = vsel %vm1125_vm0, %v609_v14, 0.0  ;;  %v482_v34 = vadd.f32 %v454_v21, %v348_v32  ;;  %v483_v35 = vadd.f32 %v473_v26, %v349_v19 }
  0xdd   :  { %v632_v36 = vmax.f32 %v624_v20, %v626_v27  ;;  %v639_v37 = vmax.f32 %v625_v31, %v627_v23 }
  0xde   :  { %v588_v40 = vadd.f32 %v560_v16, %v482_v34  ;;  %v589_v41 = vadd.f32 %v579_v15, %v483_v35 }
  0xdf   :  { %v633_v38 = vrot.slane %v632_v36, 4  ;;  %v640_v39 = vrot.slane %v639_v37, 4 }
  0xe0   :  { %v602_v51 = vadd.f32 %v1102_v46, %v588_v40  ;;  %v603_v10 = vadd.f32 %v1104_v49, %v589_v41  ;;  %v581_v53 = vpop.f32.mrf.mxu1 }
  0xe1   :  { %v634_v42 = vmax.f32 %v632_v36, %v633_v38  ;;  %v641_v43 = vmax.f32 %v639_v37, %v640_v39  ;;  %v562_v54 = vpop.f32.mrf.mxu0 }
  0xe2   :  { %v610_v58 = vmax.f32 %v602_v51, 0.0  ;;  %v611_v28 = vmax.f32 %v603_v10, 0.0 }
  0xe3   :  { %v635_v24 = vrot.slane %v634_v42, 2  ;;  %v642_v47 = vrot.slane %v641_v43, 2  ;;  %v456_v48 = vpop.f32.mrf.mxu2  ;;  %v475_v50 = vpop.f32.mrf.mxu3 }
  0xe4   :  { %v484_v30 = vadd.f32 %v456_v48, %v350_v44  ;;  %v485_v11 = vadd.f32 %v475_v50, %v351_v45  ;;  %v628_v1 = vsel %vm1111_vm13, %v610_v58, 0.0  ;;  %v629_v2 = vsel %vm1115_vm14, %v611_v28, 0.0 }
  0xe5   :  { %v636_v33 = vmax.f32 %v634_v42, %v635_v24  ;;  %v643_v52 = vmax.f32 %v641_v43, %v642_v47 }
  0xe6   :  { %v590_v55 = vadd.f32 %v562_v54, %v484_v30  ;;  %v591_v56 = vadd.f32 %v581_v53, %v485_v11 }
  0xe7   :  { %v637_v57 = vrot.slane %v636_v33, 1  ;;  %v644_v29 = vrot.slane %v643_v52, 1 }
  0xe8   :  { %v604_v59 = vadd.f32 %v1102_v46, %v590_v55  ;;  %v605_v60 = vadd.f32 %v1104_v49, %v591_v56 }
  0xe9   :  { %v645_v61 = vmax.f32 %v643_v52, %v644_v29  ;;  %v638_v63 = vmax.f32 %v636_v33, %v637_v57 }
  0xea   :  { %v612_v62 = vmax.f32 %v604_v59, 0.0  ;;  %v613_v12 = vmax.f32 %v605_v60, 0.0 }
  0xeb   :  { %v664_v0 = vrot.slane %v645_v61, 6 }
  0xec   :  { %v630_v3 = vsel %vm1121_vm15, %v612_v62, 0.0  ;;  %v631_v4 = vsel %vm1125_vm0, %v613_v12, 0.0 }
  0xed   :  { %v646_v46 = vmax.f32 %v628_v1, %v630_v3  ;;  %v653_v6 = vmax.f32 %v629_v2, %v631_v4  ;;  %v667_v49 = vsel %vm492_vm10, %v638_v63, %v664_v0 }
  0xef   :  { %v647_v17 = vrot.slane %v646_v46, 4  ;;  %v654_v8 = vrot.slane %v653_v6, 4 }
  0xf1   :  { %v648_v13 = vmax.f32 %v646_v46, %v647_v17  ;;  %v655_v14 = vmax.f32 %v653_v6, %v654_v8 }
  0xf3   :  { %v649_v15 = vrot.slane %v648_v13, 2  ;;  %v656_v18 = vrot.slane %v655_v14, 2 }
  0xf5   :  { %v650_v16 = vmax.f32 %v648_v13, %v649_v15  ;;  %v657_v32 = vmax.f32 %v655_v14, %v656_v18 }
  0xf7   :  { %v651_v5 = vrot.slane %v650_v16, 1  ;;  %v658_v19 = vrot.slane %v657_v32, 1 }
  0xf9   :  { %v659_v20 = vmax.f32 %v657_v32, %v658_v19  ;;  %v652_v9 = vmax.f32 %v650_v16, %v651_v5 }
  0xfb   :  { %v665_v31 = vrot.slane %v659_v20, 6 }
  0xfd   :  { %v668_v7 = vsel %vm492_vm10, %v652_v9, %v665_v31 }
  0xfe   :  { %v673_v21 = vrot.slane %v668_v7, 7 }
 0x100   :  { %v675_v26 = vsel %vm674_vm1, %v673_v21, %v667_v49 }
 0x101   :  { %v677_v27 = vsel %vm676_vm2, %v673_v21, %v675_v26 }
 0x102   :  { %v679_v23 = vsel %vm678_vm3, %v673_v21, %v677_v27 }
 0x103   :  { %v681_v34 = vsel %vm680_vm4, %v673_v21, %v679_v23 }
 0x104   :  { %683 = vst [vmem:[#allocation5] sm:$0xf] %v681_v34 }
 0x105   :  { %694 = dma.vmem_to_hbm [thread:$0]  %s690_s3, 64, %s692_s27, [#allocation4]  }
 0x106   :  { %893 = dma.done.wait [#allocation4], 64  }
 0x107   :  { %894 = vsyncadd [#allocation4], 4294967232 }
 0x108   :  { %699 = vsyncpa [#allocation3], 1 }
 0x109   :  { %700 = vsyncpa [#allocation4], 1 }

</bundles_post_ra>
